<compile_context>
chip_gen: v5e
topology: v5e:2x2
jax: 0.10.0
libtpu: 0.0.40
codegen_flags: <defaults>
</compile_context>

<pallas_src>
import jax
import jax.numpy as jnp
from jax import lax
from jax.experimental import pallas as pl
from jax.experimental.pallas import tpu as pltpu


def _round_up(x, m):
    return ((x + m - 1) // m) * m


def _feature_tiles(D, O):
    """Lane-dense (128-multiple) padded feature dims and K/N tile sizes.

    tk: as large as possible (whole D_pad up to 2048, else largest 128-multiple
        power-of-two divisor) -> fewer k steps / accumulator round-trips.
    tn: collapse the j axis entirely when O_pad <= 512, else largest of
        {512, 256, 128} dividing O_pad -> wide, unmasked, contiguous stores.
    """
    d_pad = _round_up(D, 128)
    o_pad = _round_up(O, 128)

    if d_pad <= 2048:
        tk = d_pad
    else:
        tk = 128
        for cand in (2048, 1024, 512, 256):
            if d_pad % cand == 0:
                tk = cand
                break

    if o_pad <= 512:
        tn = o_pad
    else:
        tn = 128
        for cand in (512, 256):
            if o_pad % cand == 0:
                tn = cand
                break

    return tk, tn, d_pad, o_pad


def _batch_tiles(B, itemsize):
    """Batch tile sized to the dtype's native sublane packing; mid/large batches
    are padded to 256 rows so the 2x256^2 MXU (v6e/v7x) is filled."""
    sub = max(8, 32 // max(1, itemsize))   # f32: 8, bf16: 16, int8/fp8: 32
    b = _round_up(B, sub)
    if b > 128:
        tm = 256
        return tm, _round_up(b, tm)
    return b, b


def prepare_params(weight, bias, compute_dtype=None):
    """One-time parameter prep (do this OUTSIDE the per-call forward path):
      * transpose weight to (D, O), zero-pad features to lane-dense 128-multiples,
      * pre-tile along the output axis -> shape (O_pad//tn, D_pad, tn) so each
        (k, j) weight block is one fully contiguous DMA,
      * optional cast to bf16 for the MXU (several-x compute win on v6e/v7x and
        half the weight HBM traffic; ~1e-3 relative error).
    """
    O, D = weight.shape
    _, tn, d_pad, o_pad = _feature_tiles(D, O)
    n_j = o_pad // tn

    if compute_dtype is not None:
        weight = weight.astype(compute_dtype)

    wt = jnp.zeros((d_pad, o_pad), weight.dtype).at[:D, :O].set(weight.T)
    wt3 = wt.reshape(d_pad, n_j, tn).transpose(1, 0, 2)      # (n_j, D_pad, tn)
    b2 = jnp.zeros((1, o_pad), bias.dtype).at[0, :O].set(bias)
    return wt3, b2


# ---------------------------------------------------------------------------
# Kernels
# ---------------------------------------------------------------------------

def lnr_eigen_kernel_1k(x_ref, wt_ref, b_ref, inv_ref, o_ref):
    """Single-k specialization (D_pad == tk): no scratch, no pl.when."""
    y = jnp.dot(x_ref[...], wt_ref[...], preferred_element_type=jnp.float32)
    y = y * inv_ref[...] + b_ref[...].astype(jnp.float32)
    o_ref[...] = y.astype(o_ref.dtype)


def lnr_eigen_kernel_acc(x_ref, wt_ref, b_ref, inv_ref, o_ref, acc_ref):
    """General k-reduction path with an f32 VMEM accumulator."""
    k = pl.program_id(2)

    @pl.when(k == 0)
    def _init():
        acc_ref[...] = jnp.zeros_like(acc_ref)

    acc_ref[...] += jnp.dot(x_ref[...], wt_ref[...],
                            preferred_element_type=jnp.float32)

    @pl.when(k == pl.num_programs(2) - 1)
    def _finalize():
        y = acc_ref[...] * inv_ref[...] + b_ref[...].astype(jnp.float32)
        o_ref[...] = y.astype(o_ref.dtype)


# ---------------------------------------------------------------------------
# Forward wrapper
# ---------------------------------------------------------------------------

def lnr_eigen_forward(x, wt3, b_pad, out_features):
    """x: (B, D); wt3: (O_pad//tn, D_pad, tn) pre-tiled weight; b_pad: (1, O_pad).
    Returns (B, out_features) in x's dtype."""
    B, D = x.shape
    n_j, D_pad, tn = wt3.shape
    O_pad = n_j * tn
    tk, tn_chk, d_chk, o_chk = _feature_tiles(D, out_features)
    assert (d_chk, o_chk, tn_chk) == (D_pad, O_pad, tn), \
        "params not prepared for this (input_size, output_size)"

    out_dtype = x.dtype
    compute_itemsize = jnp.dtype(wt3.dtype).itemsize
    tm, B_pad = _batch_tiles(B, compute_itemsize)

    # Zero-pad input rows/features (zero rows/cols do not change the matmul).
    x_pad = x
    if (B_pad, D_pad) != (B, D):
        x_pad = jnp.zeros((B_pad, D_pad), x.dtype).at[:B, :D].set(x)

    # Per-row inverse norm: one tiny (B,1) XLA reduce outside the kernel.
    # 1 / max(||x||, 1e-12) == rsqrt(max(sum(x^2), 1e-24)).
    ssq = jnp.sum(jnp.square(x_pad.astype(jnp.float32)), axis=1, keepdims=True)
    inv = lax.rsqrt(jnp.maximum(ssq, 1e-24))                  # (B_pad, 1) f32

    # Match the matmul compute dtype of the prepared weights (e.g. bf16 option).
    if x_pad.dtype != wt3.dtype:
        x_pad = x_pad.astype(wt3.dtype)

    n_i = B_pad // tm
    n_k = D_pad // tk

    # VMEM budget: double-buffered x/w/out tiles + f32 accumulator + small extras.
    need = (2 * (tm * tk + tk * tn) * compute_itemsize
            + 2 * tm * tn * jnp.dtype(out_dtype).itemsize
            + tm * tn * 4
            + 4 * tm * 4 + 4 * tn * 4)
    vmem_limit = int(min(max(2 * need, 32 * 1024 * 1024), 48 * 1024 * 1024))

    if n_k == 1:
        grid = (n_i, n_j)
        kernel = lnr_eigen_kernel_1k
        in_specs = [
            pl.BlockSpec((tm, tk), lambda i, j: (i, 0)),          # x tile
            pl.BlockSpec((None, tk, tn), lambda i, j: (j, 0, 0)), # contiguous W block
            pl.BlockSpec((1, tn), lambda i, j: (0, j)),           # bias tile
            pl.BlockSpec((tm, 1), lambda i, j: (i, 0)),           # inv row norm
        ]
        out_specs = pl.BlockSpec((tm, tn), lambda i, j: (i, j))
        scratch = []
        dims = ("parallel", "parallel")
    else:
        grid = (n_i, n_j, n_k)
        kernel = lnr_eigen_kernel_acc
        in_specs = [
            pl.BlockSpec((tm, tk), lambda i, j, k: (i, k)),
            pl.BlockSpec((None, tk, tn), lambda i, j, k: (j, k, 0)),
            pl.BlockSpec((1, tn), lambda i, j, k: (0, j)),
            pl.BlockSpec((tm, 1), lambda i, j, k: (i, 0)),
        ]
        out_specs = pl.BlockSpec((tm, tn), lambda i, j, k: (i, j))
        scratch = [pltpu.VMEM((tm, tn), jnp.float32)]
        dims = ("parallel", "parallel", "arbitrary")

    out = pl.pallas_call(
        kernel,
        out_shape=jax.ShapeDtypeStruct((B_pad, O_pad), out_dtype),
        grid_spec=pltpu.PrefetchScalarGridSpec(
            num_scalar_prefetch=0,
            grid=grid,
            in_specs=in_specs,
            out_specs=out_specs,
            scratch_shapes=scratch,
        ),
        compiler_params=pltpu.CompilerParams(
            dimension_semantics=dims,
            vmem_limit_bytes=vmem_limit),
    )(x_pad, wt3, b_pad, inv)

    return out[:B, :out_features]


# ---------------------------------------------------------------------------
# Self-test
# ---------------------------------------------------------------------------

def _reference(x, weight, bias):
    norm = jnp.maximum(jnp.linalg.norm(x, axis=1, keepdims=True), 1e-12)
    return (x / norm) @ weight.T + bias


def _run_case(key, batch, input_size, output_size):
    kx, kw, kb = jax.random.split(key, 3)
    x = jax.random.normal(kx, (batch, input_size), dtype=jnp.float32)
    bound = 1.0 / (input_size ** 0.5)
    weight = jax.random.uniform(kw, (output_size, input_size),
                                minval=-bound, maxval=bound, dtype=jnp.float32)
    bias = jax.random.uniform(kb, (output_size,),
                              minval=-bound, maxval=bound, dtype=jnp.float32)

    # One-time param prep (transpose + pad + pre-tile) outside the forward path.
    wt3, b_pad = prepare_params(weight, bias)

    out = lnr_eigen_forward(x, wt3, b_pad, output_size)
    jax.block_until_ready(out)

    ref = _reference(x, weight, bias)
    assert out.shape == (batch, output_size)
    assert jnp.allclose(out, ref, atol=1e-5, rtol=1e-5), "mismatch vs reference"


if __name__ == "__main__":
    key = jax.random.PRNGKey(0)
    k1, k2 = jax.random.split(key)

    # Small shape consistent with the module (single-step, K==1 specialized path).
    _run_case(k1, batch=8, input_size=32, output_size=16)

    # Larger input_size to exercise the multi-k accumulator path as well.
    _run_case(k2, batch=8, input_size=2304, output_size=16)

    print("KERNEL_OK")
</pallas_src>

<mosaic_0001>
module attributes {stable_mosaic.version = 11 : i64} {
  func.func @lnr_eigen_kernel_1k(%arg0: i32, %arg1: i32, %arg2: memref<8x128xf32, #tpu.memory_space<vmem>>, %arg3: memref<1x128x128xf32, #tpu.memory_space<vmem>>, %arg4: memref<1x128xf32, #tpu.memory_space<vmem>>, %arg5: memref<8x1xf32, #tpu.memory_space<vmem>>, %arg6: memref<8x128xf32, #tpu.memory_space<vmem>>) attributes {dimension_semantics = [#tpu.dimension_semantics<parallel>, #tpu.dimension_semantics<parallel>], iteration_bounds = array<i64: 1, 1>, scalar_prefetch = 0 : i64, scratch_operands = 0 : i64, tpu.core_type = #tpu.core_type<tc>, window_params = [{transform_indices = @transform_0, window_bounds = array<i64: 8, 128>}, {transform_indices = @transform_1, window_bounds = array<i64: 1, 128, 128>}, {transform_indices = @transform_2, window_bounds = array<i64: 1, 128>}, {transform_indices = @transform_3, window_bounds = array<i64: 8, 1>}, {transform_indices = @transform_4, window_bounds = array<i64: 8, 128>}]} {
    %c0 = arith.constant 0 : index
    %c0_0 = arith.constant 0 : index
    %0 = vector.load %arg2[%c0, %c0_0] : memref<8x128xf32, #tpu.memory_space<vmem>>, vector<8x128xf32>
    %c0_1 = arith.constant 0 : index
    %c0_2 = arith.constant 0 : index
    %c0_3 = arith.constant 0 : index
    %1 = vector.load %arg3[%c0_1, %c0_2, %c0_3] : memref<1x128x128xf32, #tpu.memory_space<vmem>>, vector<1x128x128xf32>
    %2 = vector.shape_cast %1 : vector<1x128x128xf32> to vector<128x128xf32>
    %cst = arith.constant dense<0.000000e+00> : vector<8x128xf32>
    %3 = tpu.matmul %0, %2, %cst {dimension_numbers = #tpu.dot_dimension_numbers<[1], [0], [0], [1], [0, 0, 1, 1], [], []>} : vector<8x128xf32>, vector<128x128xf32>, vector<8x128xf32> -> vector<8x128xf32>
    %c0_4 = arith.constant 0 : index
    %c0_5 = arith.constant 0 : index
    %4 = vector.load %arg5[%c0_4, %c0_5] : memref<8x1xf32, #tpu.memory_space<vmem>>, vector<8x1xf32>
    %5 = vector.broadcast %4 : vector<8x1xf32> to vector<8x128xf32>
    %6 = arith.mulf %3, %5 : vector<8x128xf32>
    %c0_6 = arith.constant 0 : index
    %c0_7 = arith.constant 0 : index
    %7 = vector.load %arg4[%c0_6, %c0_7] : memref<1x128xf32, #tpu.memory_space<vmem>>, vector<1x128xf32>
    %8 = vector.broadcast %7 : vector<1x128xf32> to vector<8x128xf32>
    %9 = arith.addf %6, %8 : vector<8x128xf32>
    %c0_8 = arith.constant 0 : index
    %c0_9 = arith.constant 0 : index
    %10 = vector.load %arg6[%c0_8, %c0_9] : memref<8x128xf32, #tpu.memory_space<vmem>>, vector<8x128xf32>
    tpu.vector_store %arg6[%c0_8, %c0_9], %9 {strides = array<i32>} : memref<8x128xf32, #tpu.memory_space<vmem>>, vector<8x128xf32>,
    return
  }
  func.func @transform_0(%arg0: i32, %arg1: i32) -> (i32, i32) {
    %c0_i32 = arith.constant 0 : i32
    %c0_i32_0 = arith.constant 0 : i32
    return %arg0, %c0_i32 : i32, i32
  }
  func.func @transform_1(%arg0: i32, %arg1: i32) -> (i32, i32, i32) {
    %c0_i32 = arith.constant 0 : i32
    %c0_i32_0 = arith.constant 0 : i32
    %c0_i32_1 = arith.constant 0 : i32
    return %arg1, %c0_i32, %c0_i32_0 : i32, i32, i32
  }
  func.func @transform_2(%arg0: i32, %arg1: i32) -> (i32, i32) {
    %c0_i32 = arith.constant 0 : i32
    %c0_i32_0 = arith.constant 0 : i32
    return %c0_i32, %arg1 : i32, i32
  }
  func.func @transform_3(%arg0: i32, %arg1: i32) -> (i32, i32) {
    %c0_i32 = arith.constant 0 : i32
    %c0_i32_0 = arith.constant 0 : i32
    return %arg0, %c0_i32 : i32, i32
  }
  func.func @transform_4(%arg0: i32, %arg1: i32) -> (i32, i32) {
    %c0_i32 = arith.constant 0 : i32
    return %arg0, %arg1 : i32, i32
  }
}

</mosaic_0001>

<bundles_post_ra>
// kernel: tpu_custom_call.1
= control target key start
LH: loop header
LB: loop body
LE: loop exit
PB: predicated region body
PF: predicated region fallthrough
CT: control target
= control target key end

     0   :  { %9 = vsyncpa [#allocation3], 0  ;;  %s205_s0 = inlined_call_operand.vmem [shape: f32[8,128], index: 0, kind: input, shape index: {}]   ;;  %s206_s1 = inlined_call_operand.hbm [shape: f32[1,128,128], index: 1, kind: input, shape index: {}]   ;;  %s207_s2 = inlined_call_operand.vmem [shape: f32[1,128], index: 2, kind: input, shape index: {}]   ;;  %s208_s3 = inlined_call_operand.vmem [shape: f32[8,1], index: 3, kind: input, shape index: {}]   ;;  %s209_s4 = inlined_call_operand.hbm [shape: f32[8,128], index: 4, kind: output, shape index: {}]  }
   0x1   :  { %10 = vsyncpa [#allocation4], 0  ;;  %s17_s17 = sshll.u32 %s206_s1, 4  ;;  %s160_s18 = smov [#allocation2]   ;;  %s18_s17 = int_to_ptr.hbm [resolvable:$true] %s17_s17 }
   0x2   :  { %s19_s19 = sshll.u32 %s160_s18, 4  ;;  %s161_s20 = smov 128   ;;  %s20_s19 = int_to_ptr.vmem [resolvable:$true] %s19_s19 }
   0x3   :  { %s162_s21 = smov 8  }
   0x4   :  { %25 = dma.hbm_to_vmem [thread:$0]  %s18_s17, 2048, %s20_s19, [#allocation3], %s161_s20, %s161_s20, %s162_s21  }
   0x5   :  { %156 = dma.done.wait [#allocation3], 2048  }
   0x6   :  { %157 = vsyncadd [#allocation3], 4294965248  ;;  %v50_v0 = vld [vmem:[#allocation2 + $0x78] sm:$0xff]  ;;  %v49_v1 = vld [vmem:[#allocation2 + $0x70] sm:$0xff]  ;;  %v163_v2 = vmov 0   ;;  %s164_s26 = smov [#allocation5]  }
   0x7   :  { %51 = vmatpush.msra.mxu0 %v50_v0  ;;  %106 = vset.pattern.permute.xlu0 %v163_v2  ;;  %v48_v3 = vld [vmem:[#allocation2 + $0x68] sm:$0xff]  ;;  %v47_v4 = vld [vmem:[#allocation2 + $0x60] sm:$0xff]  ;;  %v46_v6 = vld [vmem:[#allocation2 + $0x58] sm:$0xff]  ;;  %s89_s27 = sshll.u32 %s164_s26, 4  ;;  %s91_s30 = sshll.u32 %s209_s4, 4  ;;  %s90_s27 = int_to_ptr.vmem [resolvable:$true] %s89_s27  ;;  %s92_s30 = int_to_ptr.hbm [resolvable:$true] %s91_s30 }
   0x8   :  { %v71_v5 = vld [vmem:[%s208_s3] sm:$0xff]  ;;  %v45_v7 = vld [vmem:[#allocation2 + $0x50] sm:$0xff]  ;;  %v44_v8 = vld [vmem:[#allocation2 + $0x48] sm:$0xff] }
   0x9   :  { %52 = vmatpush.msra.mxu0 %v49_v1  ;;  %74 = vperm.xlu0 %106, %v71_v5   ;;  %v43_v9 = vld [vmem:[#allocation2 + $0x40] sm:$0xff]  ;;  %v42_v10 = vld [vmem:[#allocation2 + $0x38] sm:$0xff]  ;;  %v41_v11 = vld [vmem:[#allocation2 + $0x30] sm:$0xff] }
   0xa   :  { %v40_v12 = vld [vmem:[#allocation2 + $0x28] sm:$0xff]  ;;  %v39_v13 = vld [vmem:[#allocation2 + $0x20] sm:$0xff]  ;;  %v38_v14 = vld [vmem:[#allocation2 + $0x18] sm:$0xff] }
   0xb   :  { %53 = vmatpush.msra.mxu0 %v48_v3  ;;  %v37_v15 = vld [vmem:[#allocation2 + $0x10] sm:$0xff]  ;;  %v36_v16 = vld [vmem:[#allocation2 + $0x8] sm:$0xff]  ;;  %v35_v17 = vld [vmem:[#allocation2] sm:$0xff] }
   0xc   :  { %v34_v18 = vld [vmem:[%s205_s0] sm:$0xff] }
   0xd   :  { %54 = vmatpush.msra.mxu0 %v47_v4  ;;  %v107_v20 = vld [vmem:[%s207_s2] ss:$0 sm:$0xff] }
   0xf   :  { %55 = vmatpush.msra.mxu0 %v46_v6 }
  0x11   :  { %56 = vmatpush.msra.mxu0 %v45_v7 }
  0x13   :  { %57 = vmatpush.msra.mxu0 %v44_v8 }
  0x15   :  { %58 = vmatpush.msra.mxu0 %v43_v9 }
  0x17   :  { %59 = vmatpush.msra.mxu0 %v42_v10 }
  0x19   :  { %60 = vmatpush.msra.mxu0 %v41_v11 }
  0x1b   :  { %61 = vmatpush.msra.mxu0 %v40_v12 }
  0x1d   :  { %62 = vmatpush.msra.mxu0 %v39_v13 }
  0x1f   :  { %63 = vmatpush.msra.mxu0 %v38_v14 }
  0x21   :  { %64 = vmatpush.msra.mxu0 %v37_v15 }
  0x23   :  { %65 = vmatpush.msra.mxu0 %v36_v16 }
  0x25   :  { %66 = vmatpush.msra.mxu0 %v35_v17 }
  0x26   :  { %67 = vmatmul.f32.vlgmr.msra.gmra.mxu0 %v34_v18 }
  0x7b   :  { %v75_v19 = vpop.permute.xlu0 %74 }
  0xa3   :  { %v68_v21 = vpop.f32.mrf.mxu0 }
  0xa4   :  { %v77_v22 = vmul.f32 %v75_v19, %v68_v21 }
  0xa6   :  { %v82_v23 = vadd.f32 %v107_v20, %v77_v22 }
  0xa8   :  { %83 = vst [vmem:[#allocation5] sm:$0xff] %v82_v23 }
  0xa9   :  { %94 = dma.vmem_to_hbm [thread:$0]  %s90_s27, 128, %s92_s30, [#allocation4]  }
  0xaa   :  { %158 = dma.done.wait [#allocation4], 128  }
  0xab   :  { %159 = vsyncadd [#allocation4], 4294967168 }
  0xac   :  { %99 = vsyncpa [#allocation3], 1 }
  0xad   :  { %100 = vsyncpa [#allocation4], 1 }

</bundles_post_ra>
